<compile_context>
chip_gen: v6e
topology: v6e:2x2x1
jax: 0.10.0
libtpu: 0.0.40
codegen_flags: <defaults>
</compile_context>

<pallas_src>
import jax
import jax.numpy as jnp
from jax.experimental import pallas as pl
from jax.experimental.pallas import tpu as pltpu


# ----------------------------------------------------------------------------
# Pallas kernel: one (batch-block, pixel-tile) step, all channels resident.
# Layout is channel-major / pixel-minor (pixels on the lane axis).
# ----------------------------------------------------------------------------
def _attention_gate_kernel(g_ref, x_ref, wgT_ref, wxT_ref, b_ref,
                           wp_ref, bp_ref, o_ref):
    # g_ref:   (Nb, F_g, TM)   x_ref:   (Nb, F_l, TM)   native activation dtype
    # wgT_ref: (F_int, F_g)    wxT_ref: (F_int, F_l)    BN-folded, activation dtype
    # b_ref:   (F_int, 1) f32  wp_ref:  (F_int, 1) f32  bp_ref: (1, 1) f32
    wgT = wgT_ref[...]
    wxT = wxT_ref[...]
    b = b_ref[...]
    wp = wp_ref[...]
    bp = bp_ref[...]
    nb = g_ref.shape[0]
    for bi in range(nb):                      # small static unroll over the batch block
        g = g_ref[bi]                         # (F_g, TM) native dtype straight to the MXU
        x = x_ref[bi]                         # (F_l, TM)
        a = jnp.dot(wgT, g, preferred_element_type=jnp.float32)
        a = a + jnp.dot(wxT, x, preferred_element_type=jnp.float32)
        a = jnp.maximum(a + b, 0.0)           # fused (BN-folded) bias + ReLU, f32

        # psi: F_int -> 1 projection as VPU broadcast-mul + sublane (XLU) reduce.
        # (For very large F_int (>=128) a (1,F_int)@(F_int,TM) MXU dot would be
        #  preferable, but this kernel is HBM-bound so the VPU form is fine.)
        p = jnp.sum(a * wp, axis=0, keepdims=True) + bp     # (1, TM)
        p = jax.nn.sigmoid(p)

        # gate the skip connection in its native dtype (only psi gets cast)
        o_ref[bi] = (x * p.astype(x.dtype)).astype(o_ref.dtype)


# ----------------------------------------------------------------------------
# BN folding (eval mode)
# ----------------------------------------------------------------------------
def _fold_bn(w, b, gamma, beta, mean, var, eps=1e-5):
    """Fold conv(weight w (Cin,Cout), bias b (Cout,)) + eval-mode BN into
    w' (Cin,Cout), b' (Cout,)."""
    s = gamma / jnp.sqrt(var + eps)          # (Cout,)
    w_f = w * s[None, :]
    b_f = b * s + (beta - mean * s)
    return w_f, b_f


# ----------------------------------------------------------------------------
# Tile picking: pixel tile from a VMEM budget + batch blocking for small HW.
# ----------------------------------------------------------------------------
_VMEM_TILE_BUDGET = 24 << 20     # in+out tiles incl. double buffering; safe on v7x (64 MiB VMEM)
_TM_MAX = 16384                  # vreg-pressure cap
_TARGET_STEP_BYTES = 1 << 20     # aim for >= ~1 MiB moved per grid step


def _round_down(v, m):
    return (v // m) * m


def _pick_tiles(N, HW, F_g, F_l, dtype_bytes):
    per_lane = (F_g + 2 * F_l) * dtype_bytes            # g + x + out bytes per pixel per batch
    tm = _VMEM_TILE_BUDGET // (2 * per_lane)             # factor 2: pipeline double-buffering
    tm = max(512, _round_down(tm, 512))
    tm = min(tm, _TM_MAX)
    if HW < 128:
        tm = HW                                           # block == full dim (always legal)
    else:
        tm = min(tm, _round_down(HW, 128))                # lane-dense; ragged tail via cdiv grid

    # v7x megacore: prefer >= 2 grid steps so both TensorCores get work.
    while N * pl.cdiv(HW, tm) < 2 and tm >= 256:
        tm = max(128, _round_down(tm // 2, 128))

    # Small-HW stages: block over batch so each grid step still moves ~1 MiB.
    Nb = 1
    while (Nb * 2 <= N and N % (Nb * 2) == 0
           and Nb * per_lane * tm < _TARGET_STEP_BYTES
           and 2 * (Nb * 2) * per_lane * tm <= _VMEM_TILE_BUDGET
           and (N // (Nb * 2)) * pl.cdiv(HW, tm) >= 2):
        Nb *= 2
    return Nb, tm


# ----------------------------------------------------------------------------
# Wrapper: BN folding + pallas_call on the native NCHW (N, C, HW) view
# ----------------------------------------------------------------------------
def attention_gate(g_nchw, x_nchw, params):
    N, F_g, H, W = g_nchw.shape
    Nx, F_l, Hx, Wx = x_nchw.shape
    assert (N, H, W) == (Nx, Hx, Wx)
    F_int = params["wg"].shape[1]
    HW = H * W
    act_dtype = x_nchw.dtype
    dtype_bytes = jnp.dtype(act_dtype).itemsize

    # fold BatchNorm (eval mode) into each 1x1 conv
    wg, bg = _fold_bn(params["wg"], params["bg"], params["bn_g_gamma"],
                      params["bn_g_beta"], params["bn_g_mean"], params["bn_g_var"])
    wx, bx = _fold_bn(params["wx"], params["bx"], params["bn_x_gamma"],
                      params["bn_x_beta"], params["bn_x_mean"], params["bn_x_var"])
    wp, bp = _fold_bn(params["wp"], params["bp"], params["bn_p_gamma"],
                      params["bn_p_beta"], params["bn_p_mean"], params["bn_p_var"])

    # tiny weights as (C_out, C_in) in the activation dtype (native MXU path);
    # biases / psi weight stay f32 (they combine with the f32 accumulator).
    wgT = jnp.transpose(wg).astype(g_nchw.dtype)          # (F_int, F_g)
    wxT = jnp.transpose(wx).astype(act_dtype)             # (F_int, F_l)
    b_gx = (bg + bx).reshape(F_int, 1).astype(jnp.float32)
    wp_col = wp.reshape(F_int, 1).astype(jnp.float32)
    bp_s = bp.reshape(1, 1).astype(jnp.float32)

    # NCHW -> (N, C, HW): contiguous reshape, no extra HBM pass
    g3 = g_nchw.reshape(N, F_g, HW)
    x3 = x_nchw.reshape(N, F_l, HW)

    Nb, tm = _pick_tiles(N, HW, F_g, F_l, dtype_bytes)
    grid = (N // Nb, pl.cdiv(HW, tm))

    # explicit scoped-VMEM limit with headroom (portable to v7x's 64 MiB)
    tiles_bytes = 2 * Nb * (F_g + 2 * F_l) * tm * dtype_bytes
    vmem_limit = int(min(max(tiles_bytes * 3 // 2 + (4 << 20), 32 << 20), 56 << 20))

    cost = pl.CostEstimate(
        flops=int(N * HW * (2 * F_int * (F_g + F_l) + 3 * F_int + F_l)),
        transcendentals=int(N * HW),
        bytes_accessed=int(dtype_bytes * N * HW * (F_g + 2 * F_l)
                           + 4 * (F_int * (F_g + F_l + 2) + 1)),
    )

    out3 = pl.pallas_call(
        _attention_gate_kernel,
        out_shape=jax.ShapeDtypeStruct((N, F_l, HW), act_dtype),
        grid_spec=pltpu.PrefetchScalarGridSpec(
            num_scalar_prefetch=0,
            grid=grid,
            in_specs=[
                pl.BlockSpec((Nb, F_g, tm), lambda n, j: (n, 0, j)),   # g tile
                pl.BlockSpec((Nb, F_l, tm), lambda n, j: (n, 0, j)),   # x tile
                pl.BlockSpec((F_int, F_g), lambda n, j: (0, 0)),       # W_g^T (folded)
                pl.BlockSpec((F_int, F_l), lambda n, j: (0, 0)),       # W_x^T (folded)
                pl.BlockSpec((F_int, 1), lambda n, j: (0, 0)),         # b_g + b_x
                pl.BlockSpec((F_int, 1), lambda n, j: (0, 0)),         # W_psi (folded)
                pl.BlockSpec((1, 1), lambda n, j: (0, 0)),             # b_psi (folded)
            ],
            out_specs=pl.BlockSpec((Nb, F_l, tm), lambda n, j: (n, 0, j)),
        ),
        compiler_params=pltpu.CompilerParams(
            dimension_semantics=("parallel", "parallel"),
            vmem_limit_bytes=vmem_limit),
        cost_estimate=cost,
    )(g3, x3, wgT, wxT, b_gx, wp_col, bp_s)

    # free reshape back to NCHW
    return out3.reshape(N, F_l, H, W)


# ----------------------------------------------------------------------------
# Pure-JAX reference (same eval-mode BN semantics) for a sanity check.
# ----------------------------------------------------------------------------
def attention_gate_ref(g_nchw, x_nchw, params):
    wg, bg = _fold_bn(params["wg"], params["bg"], params["bn_g_gamma"],
                      params["bn_g_beta"], params["bn_g_mean"], params["bn_g_var"])
    wx, bx = _fold_bn(params["wx"], params["bx"], params["bn_x_gamma"],
                      params["bn_x_beta"], params["bn_x_mean"], params["bn_x_var"])
    wp, bp = _fold_bn(params["wp"], params["bp"], params["bn_p_gamma"],
                      params["bn_p_beta"], params["bn_p_mean"], params["bn_p_var"])
    g = jnp.transpose(g_nchw, (0, 2, 3, 1))
    x = jnp.transpose(x_nchw, (0, 2, 3, 1))
    g1 = jnp.einsum("nhwc,cd->nhwd", g, wg) + bg
    x1 = jnp.einsum("nhwc,cd->nhwd", x, wx) + bx
    a = jnp.maximum(g1 + x1, 0.0)
    p = jax.nn.sigmoid(jnp.einsum("nhwd,de->nhwe", a, wp) + bp)
    out = x * p
    return jnp.transpose(out, (0, 3, 1, 2))


# ----------------------------------------------------------------------------
# Deterministic parameter init + run
# ----------------------------------------------------------------------------
def init_params(key, F_g, F_l, F_int):
    ks = jax.random.split(key, 12)
    p = {
        # 1x1 conv weights stored as (C_in, C_out); biases (C_out,)
        "wg": jax.random.normal(ks[0], (F_g, F_int), jnp.float32) * 0.1,
        "bg": jax.random.normal(ks[1], (F_int,), jnp.float32) * 0.1,
        "wx": jax.random.normal(ks[2], (F_l, F_int), jnp.float32) * 0.1,
        "bx": jax.random.normal(ks[3], (F_int,), jnp.float32) * 0.1,
        "wp": jax.random.normal(ks[4], (F_int, 1), jnp.float32) * 0.1,
        "bp": jax.random.normal(ks[5], (1,), jnp.float32) * 0.1,
        # BatchNorm (eval mode) params / running stats
        "bn_g_gamma": 1.0 + 0.1 * jax.random.normal(ks[6], (F_int,), jnp.float32),
        "bn_g_beta": 0.1 * jax.random.normal(ks[7], (F_int,), jnp.float32),
        "bn_g_mean": 0.1 * jax.random.normal(ks[8], (F_int,), jnp.float32),
        "bn_g_var": 0.5 + jnp.abs(jax.random.normal(ks[9], (F_int,), jnp.float32)) * 0.1,
        "bn_x_gamma": jnp.ones((F_int,), jnp.float32),
        "bn_x_beta": jnp.zeros((F_int,), jnp.float32),
        "bn_x_mean": jnp.zeros((F_int,), jnp.float32),
        "bn_x_var": jnp.ones((F_int,), jnp.float32),
        "bn_p_gamma": 1.0 + 0.1 * jax.random.normal(ks[10], (1,), jnp.float32),
        "bn_p_beta": 0.1 * jax.random.normal(ks[11], (1,), jnp.float32),
        "bn_p_mean": jnp.zeros((1,), jnp.float32),
        "bn_p_var": jnp.ones((1,), jnp.float32),
    }
    return p


if __name__ == "__main__":
    F_g, F_l, F_int = 8, 4, 16
    N, H, W = 2, 16, 16

    key = jax.random.PRNGKey(0)
    kg, kx, kp = jax.random.split(key, 3)
    g = jax.random.normal(kg, (N, F_g, H, W), jnp.float32)   # gating signal (NCHW)
    x = jax.random.normal(kx, (N, F_l, H, W), jnp.float32)   # skip features (NCHW)
    params = init_params(kp, F_g, F_l, F_int)

    out = attention_gate(g, x, params)
    out = jax.block_until_ready(out)

    ref = attention_gate_ref(g, x, params)
    assert out.shape == (N, F_l, H, W)
    assert jnp.max(jnp.abs(out - ref)) < 1e-5, "Pallas kernel mismatch vs reference"

    print("KERNEL_OK")
</pallas_src>

<mosaic_0001>
module attributes {stable_mosaic.version = 11 : i64} {
  func.func @_attention_gate_kernel(%arg0: i32, %arg1: i32, %arg2: memref<1x8x256xf32, #tpu.memory_space<vmem>>, %arg3: memref<1x4x256xf32, #tpu.memory_space<vmem>>, %arg4: memref<16x8xf32, #tpu.memory_space<vmem>>, %arg5: memref<16x4xf32, #tpu.memory_space<vmem>>, %arg6: memref<16x1xf32, #tpu.memory_space<vmem>>, %arg7: memref<16x1xf32, #tpu.memory_space<vmem>>, %arg8: memref<1x1xf32, #tpu.memory_space<vmem>>, %arg9: memref<1x4x256xf32, #tpu.memory_space<vmem>>) attributes {dimension_semantics = [#tpu.dimension_semantics<parallel>, #tpu.dimension_semantics<parallel>], iteration_bounds = array<i64: 2, 1>, scalar_prefetch = 0 : i64, scratch_operands = 0 : i64, tpu.core_type = #tpu.core_type<tc>, window_params = [{transform_indices = @transform_0, window_bounds = array<i64: 1, 8, 256>}, {transform_indices = @transform_1, window_bounds = array<i64: 1, 4, 256>}, {pipeline_mode = #tpu.pipeline_mode<synchronous>, transform_indices = @transform_2, window_bounds = array<i64: 16, 8>}, {pipeline_mode = #tpu.pipeline_mode<synchronous>, transform_indices = @transform_3, window_bounds = array<i64: 16, 4>}, {pipeline_mode = #tpu.pipeline_mode<synchronous>, transform_indices = @transform_4, window_bounds = array<i64: 16, 1>}, {pipeline_mode = #tpu.pipeline_mode<synchronous>, transform_indices = @transform_5, window_bounds = array<i64: 16, 1>}, {pipeline_mode = #tpu.pipeline_mode<synchronous>, transform_indices = @transform_6, window_bounds = array<i64: 1, 1>}, {transform_indices = @transform_7, window_bounds = array<i64: 1, 4, 256>}]} {
    %c0 = arith.constant 0 : index
    %c0_0 = arith.constant 0 : index
    %0 = vector.load %arg4[%c0, %c0_0] : memref<16x8xf32, #tpu.memory_space<vmem>>, vector<16x8xf32>
    %c0_1 = arith.constant 0 : index
    %c0_2 = arith.constant 0 : index
    %1 = vector.load %arg5[%c0_1, %c0_2] : memref<16x4xf32, #tpu.memory_space<vmem>>, vector<16x4xf32>
    %c0_3 = arith.constant 0 : index
    %c0_4 = arith.constant 0 : index
    %2 = vector.load %arg6[%c0_3, %c0_4] : memref<16x1xf32, #tpu.memory_space<vmem>>, vector<16x1xf32>
    %c0_5 = arith.constant 0 : index
    %c0_6 = arith.constant 0 : index
    %3 = vector.load %arg7[%c0_5, %c0_6] : memref<16x1xf32, #tpu.memory_space<vmem>>, vector<16x1xf32>
    %c0_7 = arith.constant 0 : index
    %c0_8 = arith.constant 0 : index
    %4 = vector.load %arg8[%c0_7, %c0_8] : memref<1x1xf32, #tpu.memory_space<vmem>>, vector<1x1xf32>
    %c0_9 = arith.constant 0 : index
    %c0_10 = arith.constant 0 : index
    %c0_11 = arith.constant 0 : index
    %5 = vector.load %arg2[%c0_9, %c0_10, %c0_11] : memref<1x8x256xf32, #tpu.memory_space<vmem>>, vector<1x8x256xf32>
    %6 = vector.shape_cast %5 : vector<1x8x256xf32> to vector<8x256xf32>
    %c0_12 = arith.constant 0 : index
    %c0_13 = arith.constant 0 : index
    %c0_14 = arith.constant 0 : index
    %7 = vector.load %arg3[%c0_12, %c0_13, %c0_14] : memref<1x4x256xf32, #tpu.memory_space<vmem>>, vector<1x4x256xf32>
    %8 = vector.shape_cast %7 : vector<1x4x256xf32> to vector<4x256xf32>
    %cst = arith.constant dense<0.000000e+00> : vector<16x256xf32>
    %9 = tpu.matmul %0, %6, %cst {dimension_numbers = #tpu.dot_dimension_numbers<[1], [0], [0], [1], [0, 0, 1, 1], [], []>} : vector<16x8xf32>, vector<8x256xf32>, vector<16x256xf32> -> vector<16x256xf32>
    %cst_15 = arith.constant dense<0.000000e+00> : vector<16x256xf32>
    %10 = tpu.matmul %1, %8, %cst_15 {dimension_numbers = #tpu.dot_dimension_numbers<[1], [0], [0], [1], [0, 0, 1, 1], [], []>} : vector<16x4xf32>, vector<4x256xf32>, vector<16x256xf32> -> vector<16x256xf32>
    %11 = arith.addf %9, %10 : vector<16x256xf32>
    %12 = vector.broadcast %2 : vector<16x1xf32> to vector<16x256xf32>
    %13 = arith.addf %11, %12 : vector<16x256xf32>
    %cst_16 = arith.constant 0.000000e+00 : f32
    %14 = vector.broadcast %cst_16 : f32 to vector<16x256xf32>
    %15 = arith.maximumf %13, %14 : vector<16x256xf32>
    %16 = vector.broadcast %3 : vector<16x1xf32> to vector<16x256xf32>
    %17 = arith.mulf %15, %16 : vector<16x256xf32>
    %cst_17 = arith.constant dense<0.000000e+00> : vector<256xf32>
    %18 = vector.multi_reduction <add>, %17, %cst_17 [0] : vector<16x256xf32> to vector<256xf32>
    %19 = vector.shape_cast %18 : vector<256xf32> to vector<1x256xf32>
    %20 = vector.broadcast %4 : vector<1x1xf32> to vector<1x256xf32>
    %21 = arith.addf %19, %20 : vector<1x256xf32>
    %22 = arith.negf %21 : vector<1x256xf32>
    %23 = math.exp %22 : vector<1x256xf32>
    %cst_18 = arith.constant 1.000000e+00 : f32
    %24 = vector.broadcast %cst_18 : f32 to vector<1x256xf32>
    %25 = arith.addf %24, %23 : vector<1x256xf32>
    %26 = arith.divf %24, %25 : vector<1x256xf32>
    %27 = vector.broadcast %26 : vector<1x256xf32> to vector<4x256xf32>
    %28 = arith.mulf %8, %27 : vector<4x256xf32>
    %c0_19 = arith.constant 0 : index
    %c0_20 = arith.constant 0 : index
    %c0_21 = arith.constant 0 : index
    %29 = vector.load %arg9[%c0_19, %c0_20, %c0_21] : memref<1x4x256xf32, #tpu.memory_space<vmem>>, vector<1x4x256xf32>
    %30 = vector.shape_cast %29 : vector<1x4x256xf32> to vector<4x256xf32>
    %31 = vector.shape_cast %28 : vector<4x256xf32> to vector<1x4x256xf32>
    tpu.vector_store %arg9[%c0_19, %c0_20, %c0_21], %31 {strides = array<i32>} : memref<1x4x256xf32, #tpu.memory_space<vmem>>, vector<1x4x256xf32>,
    return
  }
  func.func @transform_0(%arg0: i32, %arg1: i32) -> (i32, i32, i32) {
    %c0_i32 = arith.constant 0 : i32
    %c0_i32_0 = arith.constant 0 : i32
    return %arg0, %c0_i32, %arg1 : i32, i32, i32
  }
  func.func @transform_1(%arg0: i32, %arg1: i32) -> (i32, i32, i32) {
    %c0_i32 = arith.constant 0 : i32
    %c0_i32_0 = arith.constant 0 : i32
    return %arg0, %c0_i32, %arg1 : i32, i32, i32
  }
  func.func @transform_2(%arg0: i32, %arg1: i32) -> (i32, i32) {
    %c0_i32 = arith.constant 0 : i32
    %c0_i32_0 = arith.constant 0 : i32
    %c0_i32_1 = arith.constant 0 : i32
    return %c0_i32, %c0_i32_0 : i32, i32
  }
  func.func @transform_3(%arg0: i32, %arg1: i32) -> (i32, i32) {
    %c0_i32 = arith.constant 0 : i32
    %c0_i32_0 = arith.constant 0 : i32
    %c0_i32_1 = arith.constant 0 : i32
    return %c0_i32, %c0_i32_0 : i32, i32
  }
  func.func @transform_4(%arg0: i32, %arg1: i32) -> (i32, i32) {
    %c0_i32 = arith.constant 0 : i32
    %c0_i32_0 = arith.constant 0 : i32
    %c0_i32_1 = arith.constant 0 : i32
    return %c0_i32, %c0_i32_0 : i32, i32
  }
  func.func @transform_5(%arg0: i32, %arg1: i32) -> (i32, i32) {
    %c0_i32 = arith.constant 0 : i32
    %c0_i32_0 = arith.constant 0 : i32
    %c0_i32_1 = arith.constant 0 : i32
    return %c0_i32, %c0_i32_0 : i32, i32
  }
  func.func @transform_6(%arg0: i32, %arg1: i32) -> (i32, i32) {
    %c0_i32 = arith.constant 0 : i32
    %c0_i32_0 = arith.constant 0 : i32
    %c0_i32_1 = arith.constant 0 : i32
    return %c0_i32, %c0_i32_0 : i32, i32
  }
  func.func @transform_7(%arg0: i32, %arg1: i32) -> (i32, i32, i32) {
    %c0_i32 = arith.constant 0 : i32
    %c0_i32_0 = arith.constant 0 : i32
    return %arg0, %c0_i32, %arg1 : i32, i32, i32
  }
}

</mosaic_0001>

<bundles_post_ra>
// kernel: tpu_custom_call.1
= control target key start
LH: loop header
LB: loop body
LE: loop exit
PB: predicated region body
PF: predicated region fallthrough
CT: control target
= control target key end

     0   :  { %s1071_s0 = inlined_call_operand.vmem [shape: f32[2,8,256], index: 0, kind: input, shape index: {}]   ;;  %s1072_s1 = inlined_call_operand.vmem [shape: f32[2,4,256], index: 1, kind: input, shape index: {}]   ;;  %s1073_s2 = inlined_call_operand.vmem [shape: f32[16,8], index: 2, kind: input, shape index: {}]   ;;  %s1074_s3 = inlined_call_operand.vmem [shape: f32[16,4], index: 3, kind: input, shape index: {}]   ;;  %s1075_s4 = inlined_call_operand.vmem [shape: f32[16,1], index: 4, kind: input, shape index: {}]   ;;  %s1076_s5 = inlined_call_operand.vmem [shape: f32[16,1], index: 5, kind: input, shape index: {}]   ;;  %s1077_s6 = inlined_call_operand.<no memory space> [shape: f32[1,1], index: 6, kind: input, shape index: {}]   ;;  %s1078_s7 = inlined_call_operand.hbm [shape: f32[2,4,256], index: 7, kind: output, shape index: {}]  }
   0x1   :  { %v12_v0 = vstv %s1077_s6 }
   0x2   :  { %13 = vst [vmem:[#allocation2] sm:$0x1] %v12_v0 }
   0x3   :  { %14 = vsyncpa [#allocation4], 0 }
   0x4   :  { %16 = vsyncpa [#allocation4 + $0x1], 0  ;;  %s937_s26 = smov 0   ;;  %s939_s27 = smov 0  }
   0x5   :  { %s941_s28 = smov 0   ;;  %s943_s29 = smov 0  }
   0x6   :  { %s945_s30 = smov 0   ;;  %s947_s8 = smov 0  }
   0x7 LB: > { %s719_s6 = sadd.s32 4294967295, %s889_s8   ;;  %s720_s9 = sadd.s32 4294967294, %s889_s8   ;;  %s889_s8 = sphi %s947_s8, %s22_s8   ;;  %s885_s30 = sphi %s945_s30, %s1088_s30   ;;  %s881_s29 = sphi %s943_s29, %s1087_s29   ;;  %s877_s28 = sphi %s941_s28, %s1086_s28   ;;  %s873_s27 = sphi %s939_s27, %s1085_s27   ;;  %s869_s26 = sphi %s937_s26, %s1084_s26  }
   0x8   : > { %s34_s10 = sadd.s32 1, %s885_s30  ;;  %s204_s11 = sadd.s32 1, %s877_s28 }
   0x9   : > { %p36_p0 = scmp.ge.s32.totalorder %s34_s10, 2  ;;  %p214_p1 = scmp.ne.s32.totalorder %s877_s28, %s873_s27 }
   0xa   : > { %p215_p2 = scmp.eq.s32.totalorder %s719_s6, 1  ;;  %p220_p3 = scmp.ne.s32.totalorder %s873_s27, %s869_s26 }
   0xb   : > { %s1090_s10 = smov (%p36_p0, %s34_s10), 0  ;;  %p221_p5 = scmp.eq.s32.totalorder %s720_s9, 1 }
   0xc   : > { %1080 = sst [smem:[#allocation6_spill]] %s1090_s10  ;;  %p977_p4 = por %p215_p2, %p214_p1 }
   0xd   : > { %s199_s13 = ssub.s32 %s885_s30, %s1090_s10  ;;  %p723_p6 = scmp.ge.s32.totalorder %s889_s8, 1 }
   0xe   : > { %p202_p7 = scmp.eq.s32.totalorder %s199_s13, 0  ;;  %p984_p8 = por %p221_p5, %p220_p3 }
   0xf   : > { %p280_p9 = scmp.lt.s32.totalorder %s889_s8, 3 }
  0x10   : > { %s990_s15 = scalar_select %p202_p7, %s877_s28, %s204_s11  }
  0x11   : > { %p281_p10 = pnand %p723_p6, %p280_p9 }
  0x12   : > { %p326_p11 = scmp.lt.s32.totalorder (!%p281_p10), %s881_s29, 1  ;;  %s322_s25 = sand.u32 (!%p281_p10), 1, %s873_s27  }
  0x13   : > { %284 = sbr.rel (%p281_p10) target bundleno = 306 (0x132), region = 48  ;;  %s724_s6 = sshll.u32 (!%p281_p10), %s322_s25, 3 }
  0x14   : > { %s324_s11 = scalar_lea.vmem (!%p281_p10), [#allocation3], %s724_s6  ;;  %s609_s20 = scalar_lea.sflag (!%p281_p10), [#allocation4], %s322_s25 }
  0x15   : > { %s625_s13 = sshll.u32 (!%p281_p10), %s324_s11, 4  ;;  %s626_s13 = int_to_ptr.vmem [resolvable:$true] %s625_s13 }
  0x18   : > { %v891_v1 = vmov 0.0   ;;  %v350_v2 = vld [vmem:[%s1075_s4] sm:$0xff]  ;;  %s327_s18 = scalar_select %p326_p11, %s881_s29, 1  ;;  %v892_v3 = vmov 0   ;;  %v351_v5 = vld [vmem:[%s1075_s4 + $0x8] sm:$0xff]  ;;  %vm367_vm0 = vcmask 1043456   ;;  %v584_v43 = vlaneseq }
  0x19   : > { %520 = vmatprep.mubr.f32.mxu1 %v891_v1  ;;  %436 = vmatprep.mubr.f32.mxu0 %v891_v1  ;;  %v352_v4 = vld [vmem:[%s1076_s5] sm:$0xff]  ;;  %v353_v7 = vld [vmem:[%s1076_s5 + $0x8] sm:$0xff]  ;;  %vm449_vm1 = vcmask 64512   ;;  %vm360_vm2 = vcmask 31744  }
  0x1a   : > { %802 = vset.pattern.permute.xlu0 %v892_v3  ;;  %803 = vset.pattern.permute.xlu1 %v892_v3  ;;  %s742_s21 = sshll.u32 %s327_s18, 4  ;;  %s743_s22 = sshll.u32 %s327_s18, 3  ;;  %v346_v6 = vld [vmem:[%s1073_s2] sm:$0xff]  ;;  %v347_v14 = vld [vmem:[%s1073_s2 + $0x8] sm:$0xff]  ;;  %v585_v48 = vshrl.u32 %v584_v43, 7 }
  0x1b   : > { %535 = vperm.xlu0 %802, %v350_v2   ;;  %553 = vperm.xlu1 %803, %v352_v4   ;;  %s333_s9 = scalar_lea.vmem %s1071_s0, %s742_s21  ;;  %s343_s16 = scalar_lea.vmem %s1072_s1, %s743_s22  ;;  %v348_v12 = vld [vmem:[%s1074_s3] sm:$0xff]  ;;  %v349_v15 = vld [vmem:[%s1074_s3 + $0x8] sm:$0xff] }
  0x1c   : > { %v356_v8 = vld [vmem:[%s333_s9 + $0x8] sm:$0xff]  ;;  %v355_v9 = vld [vmem:[%s333_s9] sm:$0xff]  ;;  %v586_v53 = vsub.s32 0, %v585_v48  ;;  %s744_s9 = sshll.u32 %s881_s29, 7  ;;  %s813_s18 = scalar_lea.vmem %s626_s13, 128 }
  0x1d   : > { %v1015_v10 = vld [vmem:[%s343_s16] sm:$0xff]  ;;  %486 = vmatprep.subr.mxu1 %v356_v8  ;;  %s623_s19 = scalar_lea.hbm %s1078_s7, %s744_s9  ;;  %p814_p12 = scmp.ne.s32.totalorder %s626_s13, %s813_s18 }
  0x1e   : > { %v359_v11 = vcombine.high %v1015_v10, %v1015_v10  ;;  %487 = vmatpush1.msra.mxu1 %v355_v9  ;;  %v354_v13 = vld [vmem:[#allocation2] sm:$0x1]  ;;  %s893_s21 = smov [#allocation3]  }
  0x1f   : > { %540 = vperm.xlu0 %802, %v351_v5   ;;  %558 = vperm.xlu1 %803, %v353_v7   ;;  %p815_p13 = pnand %p814_p12, %p977_p4  ;;  %s817_s10 = sshll.u32 %s893_s21, 4  ;;  %s818_s10 = int_to_ptr.vmem [resolvable:$false] %s817_s10 }
  0x20   : > { %729 = vmatprep.subr.msk.mxu0 %vm367_vm0, %v359_v11  ;;  %733 = vmatmul.mubr.msk.f32.vlgmr.msra.gmra.mxu1 %vm449_vm1, %v346_v6  ;;  %s819_s29 = scalar_lea.vmem %s818_s10, 256  ;;  %p820_p1 = scmp.lt.s32.totalorder %s626_s13, %s818_s10 }
  0x21   : > { %730 = vmatpush1.msk.msra.mxu0 %vm367_vm0, %v1015_v10  ;;  %526 = vmatprep.mubr.f32.mxu1 %v891_v1  ;;  %p816_p0 = pneg %p815_p13  ;;  %p821_p2 = scmp.lt.s32.totalorder %s819_s29, %s813_s18 }
  0x22   : > { %731 = vmatmul.mubr.msk.f32.vlgmr.msra.gmra.mxu0 %vm360_vm2, %v348_v12 }
  0x23   : > { %581 = vperm.xlu0 %802, %v354_v13   ;;  %442 = vmatprep.mubr.f32.mxu0 %v891_v1  ;;  %p822_p3 = por %p821_p2, %p820_p1 }
  0x24   : > { %734 = vmatmul.mubr.msk.f32.gmra.mxu1 %vm449_vm1, %v347_v14 }
  0x25   : > { %p823_p5 = pnand %p822_p3, %p816_p0 }
  0x26   : > { %732 = vmatmul.mubr.msk.f32.gmra.mxu0 %vm360_vm2, %v349_v15 }
  0x96   : > { %v536_v17 = vpop.permute.xlu0 %535  ;;  %v554_v25 = vpop.permute.xlu1 %553 }
  0x9a   : > { %v541_v27 = vpop.permute.xlu0 %540  ;;  %v559_v38 = vpop.permute.xlu1 %558 }
  0x9e   : > { %v582_v56 = vpop.permute.xlu0 %581 }
  0x9f   : > { %v587_v59 = vrot.slane %v582_v56, %v586_v53 }
  0xe0   : > { %v522_v16 = vpop.f32.mrf.mxu1 }
  0xe2   : > { %v438_v18 = vpop.f32.mrf.mxu0  ;;  %v524_v19 = vpop.f32.mrf.mxu1 }
  0xe3   : > { %v523_v20 = vadd.f32 %v522_v16, %v438_v18 }
  0xe4   : > { %v440_v21 = vpop.f32.mrf.mxu0  ;;  %v528_v22 = vpop.f32.mrf.mxu1 }
  0xe5   : > { %v543_v23 = vadd.f32 %v536_v17, %v523_v20  ;;  %v525_v24 = vadd.f32 %v524_v19, %v440_v21 }
  0xe6   : > { %v444_v26 = vpop.f32.mrf.mxu0  ;;  %v530_v30 = vpop.f32.mrf.mxu1 }
  0xe7   : > { %v544_v28 = vadd.f32 %v536_v17, %v525_v24  ;;  %v529_v29 = vadd.f32 %v528_v22, %v444_v26  ;;  %v547_v32 = vmax.f32 %v543_v23, 0.0 }
  0xe8   : > { %v446_v31 = vpop.f32.mrf.mxu0 }
  0xe9   : > { %v545_v33 = vadd.f32 %v541_v27, %v529_v29  ;;  %v531_v34 = vadd.f32 %v530_v30, %v446_v31  ;;  %v548_v35 = vmax.f32 %v544_v28, 0.0  ;;  %v561_v39 = vmul.f32 %v554_v25, %v547_v32 }
  0xeb   : > { %v546_v36 = vadd.f32 %v541_v27, %v531_v34  ;;  %v549_v37 = vmax.f32 %v545_v33, 0.0  ;;  %v562_v42 = vmul.f32 %v554_v25, %v548_v35 }
  0xed   : > { %v550_v40 = vmax.f32 %v546_v36, 0.0  ;;  %v563_v41 = vmul.f32 %v559_v38, %v549_v37 }
  0xef   : > { %v564_v44 = vmul.f32 %v559_v38, %v550_v40  ;;  %v565_v45 = vadd.f32 %v563_v41, %v561_v39 }
  0xf1   : > { %v566_v46 = vrot.slane %v565_v45, 4  ;;  %v572_v47 = vadd.f32 %v564_v44, %v562_v42 }
  0xf3   : > { %v567_v49 = vadd.f32 %v566_v46, %v565_v45  ;;  %v573_v50 = vrot.slane %v572_v47, 4 }
  0xf5   : > { %v568_v51 = vrot.slane %v567_v49, 2  ;;  %v574_v52 = vadd.f32 %v573_v50, %v572_v47 }
  0xf7   : > { %v569_v54 = vadd.f32 %v568_v51, %v567_v49  ;;  %v575_v55 = vrot.slane %v574_v52, 2 }
  0xf9   : > { %v570_v57 = vrot.slane %v569_v54, 1  ;;  %v576_v58 = vadd.f32 %v575_v55, %v574_v52 }
  0xfb   : > { %v571_v60 = vadd.f32 %v570_v57, %v569_v54  ;;  %v577_v61 = vrot.slane %v576_v58, 1 }
  0xfd   : > { %v578_v62 = vadd.f32 %v577_v61, %v576_v58  ;;  %v588_v63 = vadd.f32 %v587_v59, %v571_v60 }
  0xff   : > { %v589_v0 = vadd.f32 %v587_v59, %v578_v62  ;;  %v735_v1 = vmul.f32 -1.442695, %v588_v63 }
 0x101   : > { %805 = vpow2.f32 %v735_v1  ;;  %v736_v2 = vmul.f32 -1.442695, %v589_v0 }
 0x103   : > { %807 = vpow2.f32 %v736_v2 }
 0x10e   : > { %v806_v3 = vpop.eup %805 }
 0x10f   : > { %v596_v4 = vadd.f32 1.0, %v806_v3 }
 0x110   : > { %v808_v5 = vpop.eup %807 }
 0x111   : > { %v597_v6 = vadd.f32 1.0, %v808_v5  ;;  %809 = vrcp.f32 %v596_v4 }
 0x113   : > { %811 = vrcp.f32 %v597_v6 }
 0x11e   : > { %v810_v7 = vpop.eup %809 }
 0x120   : > { %v812_v8 = vpop.eup %811 }
 0x121   : > { %v604_v9 = vcombine.low %v810_v7, %v812_v8 }
 0x123   : > { %v606_v11 = vmul.f32 %v604_v9, %v1015_v10 }
 0x125   : > { %607 = vst [vmem:[%s324_s11] sm:$0xff] %v606_v11 }
 0x126   : > { %826 = shalt.err (!%p823_p5)
}
 0x127   : > { %s827_s22 = scalar_lea.hbm %s623_s19, 128  ;;  %s831_s25 = scalar_lea.hbm %s1078_s7, 256 }
 0x128   : > { %p828_p6 = scmp.ne.s32.totalorder %s623_s19, %s827_s22  ;;  %p832_p10 = scmp.lt.s32.totalorder %s623_s19, %s1078_s7 }
 0x129   : > { %p833_p11 = scmp.lt.s32.totalorder %s831_s25, %s827_s22 }
 0x12a   : > { %p829_p7 = pnand %p828_p6, %p977_p4 }
 0x12b   : > { %p834_p12 = por %p833_p11, %p832_p10 }
 0x12c   : > { %p830_p9 = pneg %p829_p7 }
 0x12e   : > { %p835_p13 = pnand %p834_p12, %p830_p9 }
 0x130   : > { %838 = shalt.err (!%p835_p13)
}
 0x131   : > { %745 = dma.vmem_to_hbm [thread:$0]  (%p977_p4), %s626_s13, 128, %s623_s19, %s609_s20  }
 0x132 PF: > { %p751_p0 = scmp.ge.s32.totalorder %s889_s8, 2  ;;  %s637_s11 = sand.u32 1, %s869_s26  }
 0x133   : > { %s638_s16 = scalar_lea.sflag [#allocation4], %s637_s11 }
 0x134   : > { %p748_p1 = pnand %p751_p0, %p984_p8 }
 0x136   : > { %p749_p2 = pneg %p748_p1 }
 0x138   : > { %864 = dma.done.wait (%p749_p2), %s638_s16, 128  }
 0x139   : > { %866 = vsyncadd (%p749_p2), %s638_s16, 4294967168  ;;  %s22_s8 = sadd.s32 1, %s889_s8   ;;  %s1083_s12 = sld [smem:[#allocation6_spill]] }
 0x13a   : > { %p19_p3 = scmp.ge.s32.totalorder %s22_s8, 4   ;;  %s1084_s26 = smov %s873_s27 }
 0x13b   : > { %s1085_s27 = smov %s877_s28  ;;  %s1086_s28 = smov %s990_s15 }
 0x13c   : > { %s1087_s29 = smov %s885_s30  ;;  %21 = sbr.rel (!%p19_p3) target bundleno = 7 (0x7), region = 86 }
 0x13f   : > { %s1088_s30 = smov %s1083_s12 }
 0x141   :  { %643 = vsyncpa [#allocation4], 1 }
 0x142   :  { %645 = vsyncpa [#allocation4 + $0x1], 1 }

</bundles_post_ra>
